<compile_context>
chip_gen: v6e
topology: v6e:2x2x1
jax: 0.10.0
libtpu: 0.0.40
codegen_flags: <defaults>
</compile_context>

<pallas_src>
import functools
import math

import jax
import jax.numpy as jnp
from jax.experimental import pallas as pl
from jax.experimental.pallas import tpu as pltpu


# ----------------------------------------------------------------------------
# Small helpers
# ----------------------------------------------------------------------------
def _round_up(x, m):
    return ((x + m - 1) // m) * m


def _pick_row_tile(extent, row_bytes, budget=4 << 20, even=False):
    """Largest (even, if requested) divisor of `extent` whose block fits the budget."""
    step = 2 if even else 1
    for cand in range(extent, step, -1):
        if cand % step == 0 and extent % cand == 0 and cand * row_bytes <= budget:
            return cand
    return step


# ----------------------------------------------------------------------------
# Kernel 1: patchify conv (kernel_size == stride), no HBM im2col
# ----------------------------------------------------------------------------
def _conv_patch_kernel(x_ref, w_ref, b_ref, o_ref, *, k, activation):
    """One (batch, row-block) tile of a kernel_size==stride conv.

    x_ref : (1, TH, k, Wo, k*C)  bf16
    w_ref : (k, k*C, N)          bf16
    b_ref : (1, N)               f32
    o_ref : (1, TH, Wo, N)
    """
    _, TH, _, Wo, kc = x_ref.shape
    N = o_ref.shape[-1]
    x = x_ref[...]
    acc = jnp.zeros((TH * Wo, N), jnp.float32)
    for ki in range(k):  # k in {2, 4}: static unroll, k small MXU matmuls
        xi = x[0, :, ki, :, :].reshape(TH * Wo, kc)
        acc = acc + jnp.dot(xi, w_ref[ki], preferred_element_type=jnp.float32)
    acc = acc + b_ref[...]  # f32 epilogue
    if activation == "gelu":
        # TODO(synk): PyTorch nn.GELU defaults to the erf form; tanh approx used here.
        acc = jax.nn.gelu(acc, approximate=True)
    o_ref[...] = acc.reshape(1, TH, Wo, N).astype(o_ref.dtype)


def conv_patch(x, w, b, k, activation=None, out_dtype=jnp.bfloat16):
    """x: (B,H,W,Cin) -> (B,H//k,W//k,Cout).  Host-side reshapes are bitcasts only."""
    B, H, W, C = x.shape
    kh, kw, Cin, Cout = w.shape
    assert kh == k and kw == k and Cin == C and H % k == 0 and W % k == 0
    Ho, Wo = H // k, W // k
    N = Cout

    # bf16 MXU operands (f32 accumulation inside the kernel).
    x5 = x.reshape(B, Ho, k, Wo, k * C).astype(jnp.bfloat16)
    w3 = w.reshape(k, k * C, N).astype(jnp.bfloat16)
    b2 = b.reshape(1, N).astype(jnp.float32)

    row_bytes = k * W * C * 2 + Wo * N * 4
    TH = _pick_row_tile(Ho, row_bytes, budget=4 << 20)
    grid = (B, Ho // TH)

    return pl.pallas_call(
        functools.partial(_conv_patch_kernel, k=k, activation=activation),
        out_shape=jax.ShapeDtypeStruct((B, Ho, Wo, N), out_dtype),
        grid=grid,
        in_specs=[
            pl.BlockSpec((1, TH, k, Wo, k * C), lambda bi, ri: (bi, ri, 0, 0, 0)),
            pl.BlockSpec((k, k * C, N), lambda bi, ri: (0, 0, 0)),
            pl.BlockSpec((1, N), lambda bi, ri: (0, 0)),
        ],
        out_specs=pl.BlockSpec((1, TH, Wo, N), lambda bi, ri: (bi, ri, 0, 0)),
        compiler_params=pltpu.CompilerParams(
            dimension_semantics=("parallel", "parallel")),
    )(x5, w3, b2)


# ----------------------------------------------------------------------------
# Kernel 2: generic tiled matmul with fused bias (+ optional GELU)
# ----------------------------------------------------------------------------
def _matmul_bias_act_kernel(x_ref, w_ref, b_ref, o_ref, acc_ref, *, activation):
    @pl.when(pl.program_id(2) == 0)
    def _init():
        acc_ref[...] = jnp.zeros_like(acc_ref)

    acc_ref[...] += jnp.dot(x_ref[...], w_ref[...], preferred_element_type=jnp.float32)

    @pl.when(pl.program_id(2) == pl.num_programs(2) - 1)
    def _finalize():
        out = acc_ref[...] + b_ref[...]
        if activation == "gelu":
            out = jax.nn.gelu(out, approximate=True)
        o_ref[...] = out.astype(o_ref.dtype)


def matmul_bias(x, w, b, activation=None, out_dtype=jnp.float32):
    """act(x @ w + b): bf16 MXU operands, f32 accumulation, (M,N,K)-tiled grid."""
    M, K = x.shape
    Kw, N = w.shape
    assert K == Kw
    xb = x.astype(jnp.bfloat16)
    wb = w.astype(jnp.bfloat16)
    b2 = b.reshape(1, N).astype(jnp.float32)

    # Large M tile; cdiv grid with masked partial last block (no jnp.pad of activations).
    TM = 512 if M >= 512 else _round_up(M, 8)
    if N > 256 and N % 256 == 0:
        TN = 256      # 256-multiples fill the v6e/v7x 256x256 MXU
    elif N > 128 and N % 128 == 0:
        TN = 128
    else:
        TN = N
    if K > 512 and K % 512 == 0:
        TK = 512
    elif K > 256 and K % 256 == 0:
        TK = 256
    else:
        TK = K

    grid = (pl.cdiv(M, TM), N // TN, K // TK)
    return pl.pallas_call(
        functools.partial(_matmul_bias_act_kernel, activation=activation),
        out_shape=jax.ShapeDtypeStruct((M, N), out_dtype),
        grid=grid,
        in_specs=[
            pl.BlockSpec((TM, TK), lambda i, j, kk: (i, kk)),
            pl.BlockSpec((TK, TN), lambda i, j, kk: (kk, j)),
            pl.BlockSpec((1, TN), lambda i, j, kk: (0, j)),
        ],
        out_specs=pl.BlockSpec((TM, TN), lambda i, j, kk: (i, j)),
        scratch_shapes=[pltpu.VMEM((TM, TN), jnp.float32)],
        compiler_params=pltpu.CompilerParams(
            dimension_semantics=("parallel", "parallel", "arbitrary")),
    )(xb, wb, b2)


# ----------------------------------------------------------------------------
# Kernel 3: fused FPN step — lateral 1x1 conv + bias + nearest-2x top-down add
# ----------------------------------------------------------------------------
def _lateral_topdown_kernel(x_ref, prev_ref, w_ref, b_ref, o_ref):
    """out = (x @ w + b) + nearest2x(prev), one (batch, row-block) tile.

    x_ref    : (1, TH, W, C)        bf16
    prev_ref : (1, TH//2, W//2, N)  f32
    w_ref    : (C, N)               bf16
    b_ref    : (1, N)               f32
    o_ref    : (1, TH, W, N)        f32
    """
    _, TH, W, C = x_ref.shape
    N = o_ref.shape[-1]
    th2, w2 = TH // 2, W // 2

    lat = jnp.dot(x_ref[...].reshape(TH * W, C), w_ref[...],
                  preferred_element_type=jnp.float32) + b_ref[...]
    lat = lat.reshape(TH, W, N)

    prev = prev_ref[...].reshape(th2, w2, N)
    # Nearest-2x upsample (lane dim N=d_model=128 stays fixed): repeat W, then H.
    up = jnp.broadcast_to(prev[:, :, None, :], (th2, w2, 2, N)).reshape(th2, W, N)
    up = jnp.broadcast_to(up[:, None, :, :], (th2, 2, W, N)).reshape(TH, W, N)

    o_ref[...] = (lat + up).reshape(1, TH, W, N).astype(o_ref.dtype)


def lateral_topdown_fused(x, prev, w, b):
    B, H, W, C = x.shape
    N = w.shape[1]
    Bp, H2, W2, Np = prev.shape
    assert Bp == B and 2 * H2 == H and 2 * W2 == W and Np == N

    xb = x.astype(jnp.bfloat16)
    wb = w.astype(jnp.bfloat16)
    b2 = b.reshape(1, N).astype(jnp.float32)
    prev_f32 = prev.astype(jnp.float32)

    row_bytes = W * C * 2 + (W2 * N * 4) // 2 + W * N * 4
    TH = _pick_row_tile(H, row_bytes, budget=4 << 20, even=True)
    grid = (B, H // TH)

    return pl.pallas_call(
        _lateral_topdown_kernel,
        out_shape=jax.ShapeDtypeStruct((B, H, W, N), jnp.float32),
        grid=grid,
        in_specs=[
            pl.BlockSpec((1, TH, W, C), lambda bi, ri: (bi, ri, 0, 0)),
            pl.BlockSpec((1, TH // 2, W2, N), lambda bi, ri: (bi, ri, 0, 0)),
            pl.BlockSpec((C, N), lambda bi, ri: (0, 0)),
            pl.BlockSpec((1, N), lambda bi, ri: (0, 0)),
        ],
        out_specs=pl.BlockSpec((1, TH, W, N), lambda bi, ri: (bi, ri, 0, 0)),
        compiler_params=pltpu.CompilerParams(
            dimension_semantics=("parallel", "parallel")),
    )(xb, prev_f32, wb, b2)


# ----------------------------------------------------------------------------
# Sine position encoding — parameter-free, input-independent: computed once and cached
# ----------------------------------------------------------------------------
@functools.lru_cache(maxsize=None)
def position_encoding_sine(B, H, W, num_pos_feats, temperature=10000.0):
    scale = 2.0 * math.pi
    eps = 1e-6
    y_embed = jnp.arange(1, H + 1, dtype=jnp.float32)[None, :, None] * jnp.ones((B, 1, W), jnp.float32)
    x_embed = jnp.arange(1, W + 1, dtype=jnp.float32)[None, None, :] * jnp.ones((B, H, 1), jnp.float32)
    y_embed = y_embed / (y_embed[:, -1:, :] + eps) * scale
    x_embed = x_embed / (x_embed[:, :, -1:] + eps) * scale
    dim_t = jnp.arange(num_pos_feats, dtype=jnp.float32)
    dim_t = temperature ** (2.0 * jnp.floor(dim_t / 2.0) / num_pos_feats)
    pos_x = x_embed[:, :, :, None] / dim_t
    pos_y = y_embed[:, :, :, None] / dim_t
    pos_x = jnp.stack([jnp.sin(pos_x[..., 0::2]), jnp.cos(pos_x[..., 1::2])], axis=4).reshape(B, H, W, -1)
    pos_y = jnp.stack([jnp.sin(pos_y[..., 0::2]), jnp.cos(pos_y[..., 1::2])], axis=4).reshape(B, H, W, -1)
    pos = jnp.concatenate([pos_y, pos_x], axis=3)             # (B, H, W, 2*num_pos_feats)
    return jnp.transpose(pos, (0, 3, 1, 2))                   # NCHW, as PyTorch returns


# ----------------------------------------------------------------------------
# Synthetic trunk / neck (deterministic init), channel convention as in SAM2
# ----------------------------------------------------------------------------
class SimpleTrunk:
    """Patch-embed (4x4/s4) + two 2x2/s2 downsampling convs, GELU, multi-scale output."""

    def __init__(self, key, in_chans=3, dims=(32, 64, 128)):
        self.dims = tuple(dims)
        self.channel_list = list(dims[::-1])   # lowest-res / highest-dim first
        k0, k1, k2 = jax.random.split(key, 3)
        self.w_patch = jax.random.normal(k0, (4, 4, in_chans, dims[0]), jnp.float32) * 0.1
        self.b_patch = jnp.zeros((dims[0],), jnp.float32)
        self.w_stage = []
        self.b_stage = []
        for i, kk in enumerate((k1, k2)):
            self.w_stage.append(jax.random.normal(kk, (2, 2, dims[i], dims[i + 1]), jnp.float32) * 0.1)
            self.b_stage.append(jnp.zeros((dims[i + 1],), jnp.float32))

    def __call__(self, x_nhwc):
        feats = []
        x = conv_patch(x_nhwc, self.w_patch, self.b_patch, k=4, activation="gelu")
        feats.append(x)
        for w, b in zip(self.w_stage, self.b_stage):
            x = conv_patch(x, w, b, k=2, activation="gelu")
            feats.append(x)
        return feats  # NHWC (bf16), high-res first


class SimpleFpnNeck:
    """FpnNeck-style: 1x1 lateral convs -> d_model, fused top-down 2x + sum, sine pos enc."""

    def __init__(self, key, d_model, backbone_channel_list):
        self.d_model = d_model
        self.backbone_channel_list = list(backbone_channel_list)
        keys = jax.random.split(key, len(backbone_channel_list))
        self.lateral_w = [jax.random.normal(k, (cin, d_model), jnp.float32) * 0.1
                          for k, cin in zip(keys, backbone_channel_list)]
        self.lateral_b = [jnp.zeros((d_model,), jnp.float32) for _ in backbone_channel_list]

    def __call__(self, xs):
        # xs: NHWC features, high-res first; convs[0] takes the lowest-res (highest-dim) map.
        n = len(xs) - 1
        out = [None] * len(xs)
        pos = [None] * len(xs)
        prev = None
        for i in range(n, -1, -1):
            x = xs[i]
            B, H, W, C = x.shape
            w, b = self.lateral_w[n - i], self.lateral_b[n - i]
            if prev is None:
                prev = matmul_bias(x.reshape(B * H * W, C), w, b).reshape(B, H, W, self.d_model)
            else:
                prev = lateral_topdown_fused(x, prev, w, b)   # fused lateral + 2x up + add
            out[i] = prev
            pos[i] = position_encoding_sine(B, H, W, self.d_model // 2)
        return out, pos  # features NHWC f32 (high-res first), pos NCHW f32


class ImageEncoderPallas:
    """Faithful port of the PyTorch ImageEncoder forward (dict build, scalp trim)."""

    def __init__(self, trunk, neck, scalp=0):
        assert trunk.channel_list == neck.backbone_channel_list, (
            f"Channel dims of trunk and neck do not match. "
            f"Trunk: {trunk.channel_list}, neck: {neck.backbone_channel_list}"
        )
        self.trunk = trunk
        self.neck = neck
        self.scalp = scalp

    def __call__(self, sample_nchw):
        x = jnp.transpose(sample_nchw, (0, 2, 3, 1))          # NCHW -> NHWC
        features, pos = self.neck(self.trunk(x))
        features = [jnp.transpose(f, (0, 3, 1, 2)) for f in features]  # back to NCHW
        if self.scalp > 0:
            features, pos = features[: -self.scalp], pos[: -self.scalp]
        src = features[-1]
        return {
            "vision_features": src,
            "vision_pos_enc": pos,
            "backbone_fpn": features,
        }


# ----------------------------------------------------------------------------
# Pure-JAX f32 reference of the same forward (correctness check)
# ----------------------------------------------------------------------------
def _reference_forward(sample_nchw, trunk, neck, scalp):
    def conv_ref(x, w, b, k, act):
        B, H, W, C = x.shape
        Ho, Wo = H // k, W // k
        cols = x.reshape(B, Ho, k, Wo, k, C).transpose(0, 1, 3, 2, 4, 5)
        cols = cols.reshape(B * Ho * Wo, k * k * C)
        y = cols @ w.reshape(k * k * C, -1) + b
        if act:
            y = jax.nn.gelu(y, approximate=True)
        return y.reshape(B, Ho, Wo, -1)

    x = jnp.transpose(sample_nchw, (0, 2, 3, 1)).astype(jnp.float32)
    feats = [conv_ref(x, trunk.w_patch, trunk.b_patch, 4, True)]
    for w, b in zip(trunk.w_stage, trunk.b_stage):
        feats.append(conv_ref(feats[-1], w, b, 2, True))

    n = len(feats) - 1
    outs = [None] * len(feats)
    prev = None
    for i in range(n, -1, -1):
        f = feats[i]
        B, H, W, C = f.shape
        lat = (f.reshape(-1, C) @ neck.lateral_w[n - i] + neck.lateral_b[n - i]).reshape(B, H, W, -1)
        if prev is not None:
            up = jnp.repeat(jnp.repeat(prev, 2, axis=1), 2, axis=2)
            prev = lat + up
        else:
            prev = lat
        outs[i] = prev
    features = [jnp.transpose(o, (0, 3, 1, 2)) for o in outs]
    if scalp > 0:
        features = features[:-scalp]
    return features


# ----------------------------------------------------------------------------
if __name__ == "__main__":
    key = jax.random.PRNGKey(0)
    k_in, k_trunk, k_neck = jax.random.split(key, 3)

    # Small image-like input (NCHW, like PyTorch).
    sample = jax.random.normal(k_in, (2, 3, 32, 32), jnp.float32)

    # d_model = 128 and last trunk dim = 128 -> lane-dense outputs for the FPN levels.
    trunk = SimpleTrunk(k_trunk, in_chans=3, dims=(32, 64, 128))
    neck = SimpleFpnNeck(k_neck, d_model=128, backbone_channel_list=trunk.channel_list)
    encoder = ImageEncoderPallas(trunk, neck, scalp=1)  # SAM2 uses scalp=1

    output = encoder(sample)
    output = jax.block_until_ready(output)

    # Shape checks: strides 4/8/16 on a 32x32 input; scalp=1 drops the lowest-res level,
    # so vision_features is the stride-16 (4x4) map, exactly like SAM2.
    assert output["vision_features"].shape == (2, 128, 4, 4)
    assert len(output["backbone_fpn"]) == 2 and len(output["vision_pos_enc"]) == 2
    assert output["backbone_fpn"][0].shape == (2, 128, 8, 8)
    assert output["backbone_fpn"][1].shape == (2, 128, 4, 4)
    assert output["vision_pos_enc"][0].shape == (2, 128, 8, 8)
    assert output["vision_pos_enc"][1].shape == (2, 128, 4, 4)
    assert bool(jnp.all(jnp.isfinite(output["vision_features"])))

    # Numerical check against a pure-JAX f32 reference (bf16 MXU path -> loose tolerance).
    ref_features = _reference_forward(sample, trunk, neck, scalp=1)
    for got, want in zip(output["backbone_fpn"], ref_features):
        assert jnp.allclose(got, want, rtol=5e-2, atol=2e-2), float(jnp.max(jnp.abs(got - want)))

    print("KERNEL_OK")
</pallas_src>

<mosaic_0001>
module attributes {stable_mosaic.version = 11 : i64} {
  func.func @_conv_patch_kernel(%arg0: i32, %arg1: i32, %arg2: memref<1x8x4x8x12xbf16, #tpu.memory_space<vmem>>, %arg3: memref<4x12x32xbf16, #tpu.memory_space<vmem>>, %arg4: memref<1x32xf32, #tpu.memory_space<vmem>>, %arg5: memref<1x8x8x32xbf16, #tpu.memory_space<vmem>>) attributes {dimension_semantics = [#tpu.dimension_semantics<parallel>, #tpu.dimension_semantics<parallel>], iteration_bounds = array<i64: 2, 1>, scalar_prefetch = 0 : i64, scratch_operands = 0 : i64, tpu.core_type = #tpu.core_type<tc>, window_params = [{transform_indices = @transform_0, window_bounds = array<i64: 1, 8, 4, 8, 12>}, {pipeline_mode = #tpu.pipeline_mode<synchronous>, transform_indices = @transform_1, window_bounds = array<i64: 4, 12, 32>}, {pipeline_mode = #tpu.pipeline_mode<synchronous>, transform_indices = @transform_2, window_bounds = array<i64: 1, 32>}, {transform_indices = @transform_3, window_bounds = array<i64: 1, 8, 8, 32>}]} {
    %c0 = arith.constant 0 : index
    %c0_0 = arith.constant 0 : index
    %c0_1 = arith.constant 0 : index
    %c0_2 = arith.constant 0 : index
    %c0_3 = arith.constant 0 : index
    %0 = vector.load %arg2[%c0, %c0_0, %c0_1, %c0_2, %c0_3] : memref<1x8x4x8x12xbf16, #tpu.memory_space<vmem>>, vector<1x8x4x8x12xbf16>
    %cst = arith.constant 0.000000e+00 : f32
    %1 = vector.broadcast %cst : f32 to vector<64x32xf32>
    %2 = vector.extract_strided_slice %0 {offsets = [0, 0, 0, 0, 0], sizes = [1, 8, 1, 8, 12], strides = [1, 1, 1, 1, 1]} : vector<1x8x4x8x12xbf16> to vector<1x8x1x8x12xbf16>
    %3 = vector.shape_cast %2 : vector<1x8x1x8x12xbf16> to vector<8x8x12xbf16>
    %4 = vector.shape_cast %3 : vector<8x8x12xbf16> to vector<64x12xbf16>
    %c0_4 = arith.constant 0 : index
    %c0_5 = arith.constant 0 : index
    %c0_6 = arith.constant 0 : index
    %5 = vector.load %arg3[%c0_4, %c0_5, %c0_6] : memref<4x12x32xbf16, #tpu.memory_space<vmem>>, vector<1x12x32xbf16>
    %6 = vector.shape_cast %5 : vector<1x12x32xbf16> to vector<12x32xbf16>
    %cst_7 = arith.constant dense<0.000000e+00> : vector<64x32xf32>
    %7 = tpu.matmul %4, %6, %cst_7 {dimension_numbers = #tpu.dot_dimension_numbers<[1], [0], [0], [1], [0, 0, 1, 1], [], []>} : vector<64x12xbf16>, vector<12x32xbf16>, vector<64x32xf32> -> vector<64x32xf32>
    %8 = arith.addf %1, %7 : vector<64x32xf32>
    %9 = vector.extract_strided_slice %0 {offsets = [0, 0, 1, 0, 0], sizes = [1, 8, 1, 8, 12], strides = [1, 1, 1, 1, 1]} : vector<1x8x4x8x12xbf16> to vector<1x8x1x8x12xbf16>
    %10 = vector.shape_cast %9 : vector<1x8x1x8x12xbf16> to vector<8x8x12xbf16>
    %11 = vector.shape_cast %10 : vector<8x8x12xbf16> to vector<64x12xbf16>
    %c1 = arith.constant 1 : index
    %c0_8 = arith.constant 0 : index
    %c0_9 = arith.constant 0 : index
    %12 = vector.load %arg3[%c1, %c0_8, %c0_9] : memref<4x12x32xbf16, #tpu.memory_space<vmem>>, vector<1x12x32xbf16>
    %13 = vector.shape_cast %12 : vector<1x12x32xbf16> to vector<12x32xbf16>
    %cst_10 = arith.constant dense<0.000000e+00> : vector<64x32xf32>
    %14 = tpu.matmul %11, %13, %cst_10 {dimension_numbers = #tpu.dot_dimension_numbers<[1], [0], [0], [1], [0, 0, 1, 1], [], []>} : vector<64x12xbf16>, vector<12x32xbf16>, vector<64x32xf32> -> vector<64x32xf32>
    %15 = arith.addf %8, %14 : vector<64x32xf32>
    %16 = vector.extract_strided_slice %0 {offsets = [0, 0, 2, 0, 0], sizes = [1, 8, 1, 8, 12], strides = [1, 1, 1, 1, 1]} : vector<1x8x4x8x12xbf16> to vector<1x8x1x8x12xbf16>
    %17 = vector.shape_cast %16 : vector<1x8x1x8x12xbf16> to vector<8x8x12xbf16>
    %18 = vector.shape_cast %17 : vector<8x8x12xbf16> to vector<64x12xbf16>
    %c2 = arith.constant 2 : index
    %c0_11 = arith.constant 0 : index
    %c0_12 = arith.constant 0 : index
    %19 = vector.load %arg3[%c2, %c0_11, %c0_12] : memref<4x12x32xbf16, #tpu.memory_space<vmem>>, vector<1x12x32xbf16>
    %20 = vector.shape_cast %19 : vector<1x12x32xbf16> to vector<12x32xbf16>
    %cst_13 = arith.constant dense<0.000000e+00> : vector<64x32xf32>
    %21 = tpu.matmul %18, %20, %cst_13 {dimension_numbers = #tpu.dot_dimension_numbers<[1], [0], [0], [1], [0, 0, 1, 1], [], []>} : vector<64x12xbf16>, vector<12x32xbf16>, vector<64x32xf32> -> vector<64x32xf32>
    %22 = arith.addf %15, %21 : vector<64x32xf32>
    %23 = vector.extract_strided_slice %0 {offsets = [0, 0, 3, 0, 0], sizes = [1, 8, 1, 8, 12], strides = [1, 1, 1, 1, 1]} : vector<1x8x4x8x12xbf16> to vector<1x8x1x8x12xbf16>
    %24 = vector.shape_cast %23 : vector<1x8x1x8x12xbf16> to vector<8x8x12xbf16>
    %25 = vector.shape_cast %24 : vector<8x8x12xbf16> to vector<64x12xbf16>
    %c3 = arith.constant 3 : index
    %c0_14 = arith.constant 0 : index
    %c0_15 = arith.constant 0 : index
    %26 = vector.load %arg3[%c3, %c0_14, %c0_15] : memref<4x12x32xbf16, #tpu.memory_space<vmem>>, vector<1x12x32xbf16>
    %27 = vector.shape_cast %26 : vector<1x12x32xbf16> to vector<12x32xbf16>
    %cst_16 = arith.constant dense<0.000000e+00> : vector<64x32xf32>
    %28 = tpu.matmul %25, %27, %cst_16 {dimension_numbers = #tpu.dot_dimension_numbers<[1], [0], [0], [1], [0, 0, 1, 1], [], []>} : vector<64x12xbf16>, vector<12x32xbf16>, vector<64x32xf32> -> vector<64x32xf32>
    %29 = arith.addf %22, %28 : vector<64x32xf32>
    %c0_17 = arith.constant 0 : index
    %c0_18 = arith.constant 0 : index
    %30 = vector.load %arg4[%c0_17, %c0_18] : memref<1x32xf32, #tpu.memory_space<vmem>>, vector<1x32xf32>
    %31 = vector.broadcast %30 : vector<1x32xf32> to vector<64x32xf32>
    %32 = arith.addf %29, %31 : vector<64x32xf32>
    %33 = arith.mulf %32, %32 : vector<64x32xf32>
    %34 = arith.mulf %32, %33 : vector<64x32xf32>
    %cst_19 = arith.constant 4.471500e-02 : f32
    %35 = vector.broadcast %cst_19 : f32 to vector<64x32xf32>
    %36 = arith.mulf %35, %34 : vector<64x32xf32>
    %37 = arith.addf %32, %36 : vector<64x32xf32>
    %cst_20 = arith.constant 0.797884583 : f32
    %38 = vector.broadcast %cst_20 : f32 to vector<64x32xf32>
    %39 = arith.mulf %38, %37 : vector<64x32xf32>
    %40 = math.tanh %39 : vector<64x32xf32>
    %cst_21 = arith.constant 1.000000e+00 : f32
    %41 = vector.broadcast %cst_21 : f32 to vector<64x32xf32>
    %42 = arith.addf %41, %40 : vector<64x32xf32>
    %cst_22 = arith.constant 5.000000e-01 : f32
    %43 = vector.broadcast %cst_22 : f32 to vector<64x32xf32>
    %44 = arith.mulf %43, %42 : vector<64x32xf32>
    %45 = arith.mulf %32, %44 : vector<64x32xf32>
    %46 = vector.shape_cast %45 : vector<64x32xf32> to vector<1x8x8x32xf32>
    %47 = arith.truncf %46 : vector<1x8x8x32xf32> to vector<1x8x8x32xbf16>
    %c0_23 = arith.constant 0 : index
    %c0_24 = arith.constant 0 : index
    %c0_25 = arith.constant 0 : index
    %c0_26 = arith.constant 0 : index
    %48 = vector.load %arg5[%c0_23, %c0_24, %c0_25, %c0_26] : memref<1x8x8x32xbf16, #tpu.memory_space<vmem>>, vector<1x8x8x32xbf16>
    tpu.vector_store %arg5[%c0_23, %c0_24, %c0_25, %c0_26], %47 {strides = array<i32>} : memref<1x8x8x32xbf16, #tpu.memory_space<vmem>>, vector<1x8x8x32xbf16>,
    return
  }
  func.func @transform_0(%arg0: i32, %arg1: i32) -> (i32, i32, i32, i32, i32) {
    %c0_i32 = arith.constant 0 : i32
    %c0_i32_0 = arith.constant 0 : i32
    %c0_i32_1 = arith.constant 0 : i32
    %c0_i32_2 = arith.constant 0 : i32
    return %arg0, %arg1, %c0_i32, %c0_i32_0, %c0_i32_1 : i32, i32, i32, i32, i32
  }
  func.func @transform_1(%arg0: i32, %arg1: i32) -> (i32, i32, i32) {
    %c0_i32 = arith.constant 0 : i32
    %c0_i32_0 = arith.constant 0 : i32
    %c0_i32_1 = arith.constant 0 : i32
    %c0_i32_2 = arith.constant 0 : i32
    return %c0_i32, %c0_i32_0, %c0_i32_1 : i32, i32, i32
  }
  func.func @transform_2(%arg0: i32, %arg1: i32) -> (i32, i32) {
    %c0_i32 = arith.constant 0 : i32
    %c0_i32_0 = arith.constant 0 : i32
    %c0_i32_1 = arith.constant 0 : i32
    return %c0_i32, %c0_i32_0 : i32, i32
  }
  func.func @transform_3(%arg0: i32, %arg1: i32) -> (i32, i32, i32, i32) {
    %c0_i32 = arith.constant 0 : i32
    %c0_i32_0 = arith.constant 0 : i32
    %c0_i32_1 = arith.constant 0 : i32
    return %arg0, %arg1, %c0_i32, %c0_i32_0 : i32, i32, i32, i32
  }
}

</mosaic_0001>

<bundles_post_ra>
// kernel: tpu_custom_call.1
= control target key start
LH: loop header
LB: loop body
LE: loop exit
PB: predicated region body
PF: predicated region fallthrough
CT: control target
= control target key end

     0   :  { %8 = vsyncpa [#allocation3], 0  ;;  %s1550_s0 = inlined_call_operand.hbm [shape: bf16[2,8,4,8,12], index: 0, kind: input, shape index: {}]   ;;  %s1551_s1 = inlined_call_operand.vmem [shape: bf16[4,12,32], index: 1, kind: input, shape index: {}]   ;;  %s1552_s2 = inlined_call_operand.vmem [shape: f32[1,32], index: 2, kind: input, shape index: {}]   ;;  %s1553_s3 = inlined_call_operand.hbm [shape: bf16[2,8,8,32], index: 3, kind: output, shape index: {}]  }
   0x1   :  { %10 = vsyncpa [#allocation3 + $0x1], 0 }
   0x2   :  { %11 = vsyncpa [#allocation4], 0 }
   0x3   :  { %13 = vsyncpa [#allocation4 + $0x1], 0  ;;  %s1261_s12 = smov 0   ;;  %s1263_s13 = smov 0  }
   0x4   :  { %s1265_s14 = smov 0   ;;  %s1267_s15 = smov 0  }
   0x5   :  { %s1269_s16 = smov 0   ;;  %s1271_s17 = smov 0  }
   0x6 LB: > { %s899_s18 = sadd.s32 4294967295, %s1233_s17   ;;  %s900_s19 = sadd.s32 4294967294, %s1233_s17   ;;  %s1233_s17 = sphi %s1271_s17, %s19_s17   ;;  %s1229_s16 = sphi %s1269_s16, %s1564_s16   ;;  %s1225_s15 = sphi %s1267_s15, %s1563_s15   ;;  %s1221_s14 = sphi %s1265_s14, %s1562_s14   ;;  %s1217_s13 = sphi %s1263_s13, %s1561_s13   ;;  %s1213_s12 = sphi %s1261_s12, %s1560_s12  }
   0x7   : > { %s31_s20 = sadd.s32 1, %s1229_s16  ;;  %s40_s21 = sadd.s32 1, %s1221_s14 }
   0x8   : > { %p33_p0 = scmp.ge.s32.totalorder %s31_s20, 2  ;;  %p47_p1 = scmp.ne.s32.totalorder %s1221_s14, %s1217_s13 }
   0x9   : > { %p48_p2 = scmp.eq.s32.totalorder %s1233_s17, 0  ;;  %p53_p3 = scmp.ne.s32.totalorder %s1217_s13, %s1213_s12 }
   0xa   : > { %s1566_s20 = smov (%p33_p0, %s31_s20), 0  ;;  %p54_p5 = scmp.eq.s32.totalorder %s899_s18, 0 }
   0xb   : > { %p1302_p4 = por %p48_p2, %p47_p1  ;;  %s35_s23 = ssub.s32 %s1229_s16, %s1566_s20 }
   0xc   : > { %p121_p6 = scmp.eq.s32.totalorder %s899_s18, 1  ;;  %p38_p7 = scmp.eq.s32.totalorder %s35_s23, 0 }
   0xd   : > { %p1308_p8 = por %p54_p5, %p53_p3  ;;  %p127_p10 = scmp.eq.s32.totalorder %s900_s19, 1 }
   0xe   : > { %p1312_p9 = por %p121_p6, %p47_p1  ;;  %p1035_p13 = scmp.lt.s32.totalorder %s1233_s17, 2 }
   0xf   : > { %s1317_s26 = scalar_select %p38_p7, %s1221_s14, %s40_s21  }
  0x10   : > { %p1319_p11 = por %p127_p10, %p53_p3  ;;  %s153_s28 = sand.u32 1, %s1221_s14  }
  0x11   : > { %s903_s29 = sshll.u32 %s153_s28, 7  ;;  %s957_s30 = sshll.u32 %s1229_s16, 11 }
  0x12   : > { %s166_s6 = scalar_lea.hbm %s1550_s0, %s957_s30  ;;  %s157_s7 = scalar_lea.vmem [#allocation2], %s903_s29 }
  0x13   : > { %s167_s8 = sshll.u32 %s157_s7, 4  ;;  %p1332_p0 = pnand %p1035_p13, %p1302_p4  ;;  %s168_s8 = int_to_ptr.vmem [resolvable:$true] %s167_s8 }
  0x14   : > { %p906_p1 = scmp.ge.s32.totalorder %s1233_s17, 1  ;;  %s154_s10 = scalar_lea.sflag [#allocation3], %s153_s28 }
  0x15   : > { %p1127_p2 = pneg %p1332_p0  ;;  %s1138_s11 = scalar_lea.vmem %s168_s8, 2048 }
  0x16   : > { %p1139_p3 = scmp.ne.s32.totalorder %s168_s8, %s1138_s11  ;;  %s1235_s18 = smov [#allocation2]  }
  0x17   : > { %s1143_s19 = sshll.u32 %s1235_s18, 4  ;;  %s1144_s19 = int_to_ptr.vmem [resolvable:$false] %s1143_s19 }
  0x18   : > { %p1141_p5 = pnand %p1139_p3, %p1127_p2  ;;  %s1145_s21 = scalar_lea.vmem %s1144_s19, 4096 }
  0x19   : > { %p1146_p7 = scmp.lt.s32.totalorder %s168_s8, %s1144_s19  ;;  %p1147_p10 = scmp.lt.s32.totalorder %s1145_s21, %s1138_s11 }
  0x1a   : > { %p1142_p6 = pneg %p1141_p5 }
  0x1b   : > { %p1148_p12 = por %p1147_p10, %p1146_p7 }
  0x1d   : > { %p1149_p4 = pnand %p1148_p12, %p1142_p6 }
  0x1f   : > { %1152 = shalt.err (!%p1149_p4)
}
  0x20   : > { %s1236_s22 = smov 64   ;;  %s1237_s23 = smov 4  }
  0x21   : > { %1030 = dma.hbm_to_vmem [thread:$0]  (!%p1332_p0), %s166_s6, 2048, %s168_s8, %s154_s10, %s1236_s22, %s1236_s22, %s1237_s23  }
  0x22   : > { %p175_p13 = scmp.lt.s32.totalorder %s1233_s17, 3 }
  0x24   : > { %p176_p2 = pnand %p906_p1, %p175_p13 }
  0x25   : > { %s1345_s28 = sand.u32 (!%p176_p2), 1, %s1217_s13  }
  0x26   : > { %179 = sbr.rel (%p176_p2) target bundleno = 325 (0x145), region = 32  ;;  %s907_s29 = sshll.u32 (!%p176_p2), %s1345_s28, 7 }
  0x27   : > { %s182_s30 = scalar_lea.sflag (!%p176_p2), [#allocation3], %s1345_s28  ;;  %s1349_s4 = scalar_lea.vmem (!%p176_p2), [#allocation2], %s907_s29 }
  0x2b   : > { %1204 = dma.done.wait (%p1308_p8), %s182_s30, 2048  }
  0x2c   : > { %1206 = vsyncadd (%p1308_p8), %s182_s30, 4294965248  ;;  %vm286_vm0 = vcmask 1045504   ;;  %v1089_v0 = vld [vmem:[%s1551_s1 + $0x8] sm:$0x3f]   ;;  %v1090_v1 = vld [vmem:[%s1551_s1] sm:$0x3f]  }
  0x2d   : > { %1019 = vmatprep.subr.msk.bf16.mxu0 %vm286_vm0, %v1089_v0  ;;  %v288_v2 = vsel %vm286_vm0, %v1089_v0, 0  ;;  %vm273_vm1 = vcmask 97280   ;;  %1020 = vmatprep.subr.msk.bf16.mxu1 %vm286_vm0, %v1090_v1  ;;  %v393_v3 = vsel %vm286_vm0, %v1090_v1, 0  ;;  %v1091_v4 = vld [vmem:[%s1349_s4 + $0x4] ss:$16 sps:$4 sm:$0xff]   ;;  %s908_s21 = sshll.u32 %s1345_s28, 5 }
  0x2e   : > { %980 = vmatpush3.bf16.msra.mxu0 %v288_v2  ;;  %990 = vmatpush3.bf16.msra.mxu1 %v393_v3  ;;  %v1092_v5 = vld [vmem:[%s1349_s4] ss:$16 sps:$4 sm:$0xff]   ;;  %v1093_v6 = vld [vmem:[%s1349_s4 + $0x24] ss:$16 sps:$4 sm:$0xff]   ;;  %v1096_v9 = vld [vmem:[%s1551_s1 + $0x18] sm:$0x3f]  }
  0x2f   : > { %981 = vmatprep.mubr.msk.bf16.mxu0 %vm273_vm1, %v1091_v4  ;;  %991 = vmatprep.mubr.msk.bf16.mxu1 %vm273_vm1, %v1092_v5  ;;  %v1094_v7 = vld [vmem:[%s1349_s4 + $0x20] ss:$16 sps:$4 sm:$0xff]   ;;  %v1097_v11 = vld [vmem:[%s1349_s4 + $0x44] ss:$16 sps:$4 sm:$0xff]   ;;  %v617_v12 = vsel %vm286_vm0, %v1096_v9, 0  ;;  %vm787_vm2 = vcmask 257024  }
  0x30   : > { %v1095_v8 = vld [vmem:[%s1551_s1 + $0x10] sm:$0x3f]   ;;  %1022 = vmatprep.subr.msk.bf16.mxu1 %vm286_vm0, %v1096_v9  ;;  %v1101_v16 = vld [vmem:[%s1349_s4 + $0x8] ss:$16 sps:$4 sm:$0xff]   ;;  %v1102_v17 = vld [vmem:[%s1349_s4 + $0xc] ss:$16 sps:$4 sm:$0xff]  }
  0x31   : > { %982 = vmatmul.mubr.msk.bf16.vlgmr.msra.gmra.mxu0 %vm273_vm1, %v1093_v6  ;;  %992 = vmatmul.mubr.msk.bf16.vlgmr.msra.gmra.mxu1 %vm273_vm1, %v1094_v7  ;;  %v501_v10 = vsel %vm286_vm0, %v1095_v8, 0  ;;  %v1098_v13 = vld [vmem:[%s1349_s4 + $0x40] ss:$16 sps:$4 sm:$0xff]   ;;  %v1099_v14 = vld [vmem:[%s1349_s4 + $0x64] ss:$16 sps:$4 sm:$0xff]   ;;  %s1471_s22 = scalar_lea.vmem [#allocation5], %s908_s21 }
  0x32   : > { %1021 = vmatprep.subr.msk.bf16.mxu0 %vm286_vm0, %v1095_v8  ;;  %1010 = vmatpush3.bf16.msra.mxu1 %v617_v12  ;;  %v1100_v15 = vld [vmem:[%s1349_s4 + $0x60] ss:$16 sps:$4 sm:$0xff]   ;;  %v1103_v18 = vld [vmem:[%s1349_s4 + $0x28] ss:$16 sps:$4 sm:$0xff]   ;;  %v1104_v19 = vld [vmem:[%s1349_s4 + $0x2c] ss:$16 sps:$4 sm:$0xff]  }
  0x33   : > { %1000 = vmatpush3.bf16.msra.mxu0 %v501_v10  ;;  %985 = vmatprep.mubr.msk.bf16.mxu0 %vm273_vm1, %v1097_v11  ;;  %v1105_v20 = vld [vmem:[%s1349_s4 + $0x48] ss:$16 sps:$4 sm:$0xff]   ;;  %v1106_v21 = vld [vmem:[%s1349_s4 + $0x4c] ss:$16 sps:$4 sm:$0xff]   ;;  %v1410_v45 = vld [vmem:[%s1552_s2] ss:$0 sm:$0xff] }
  0x34   : > { %995 = vmatprep.mubr.msk.bf16.mxu1 %vm273_vm1, %v1098_v13  ;;  %v1107_v22 = vld [vmem:[%s1349_s4 + $0x68] ss:$16 sps:$4 sm:$0xff]   ;;  %v1108_v23 = vld [vmem:[%s1349_s4 + $0x6c] ss:$16 sps:$4 sm:$0xff]   ;;  %s958_s23 = sshll.u32 %s1225_s15, 9  ;;  %s812_s29 = sshll.u32 %s1471_s22, 4  ;;  %s1498_s29 = int_to_ptr.vmem [resolvable:$true] %s812_s29 }
  0x35   : > { %s1496_s5 = scalar_lea.hbm %s1553_s3, %s958_s23  ;;  %s797_s15 = scalar_lea.sflag [#allocation4], %s1345_s28 }
  0x36   : > { %s1153_s6 = scalar_lea.vmem %s1498_s29, 512  ;;  %s1238_s7 = smov [#allocation5]  }
  0x37   : > { %p1154_p8 = scmp.ne.s32.totalorder %s1498_s29, %s1153_s6  ;;  %s1157_s8 = sshll.u32 %s1238_s7, 4  ;;  %s1158_s8 = int_to_ptr.vmem [resolvable:$false] %s1157_s8 }
  0x38   : > { %s1159_s24 = scalar_lea.vmem %s1158_s8, 1024  ;;  %p1160_p1 = scmp.lt.s32.totalorder %s1498_s29, %s1158_s8 }
  0x39   : > { %986 = vmatmul.mubr.msk.bf16.gmra.mxu0 %vm273_vm1, %v1099_v14  ;;  %996 = vmatmul.mubr.msk.bf16.gmra.mxu1 %vm273_vm1, %v1100_v15  ;;  %p1155_p12 = pnand %p1154_p8, %p1312_p9  ;;  %p1161_p3 = scmp.lt.s32.totalorder %s1159_s24, %s1153_s6 }
  0x3a   : > { %1001 = vmatprep.mubr.msk.bf16.mxu0 %vm273_vm1, %v1101_v16  ;;  %1011 = vmatprep.mubr.msk.bf16.mxu1 %vm273_vm1, %v1102_v17 }
  0x3b   : > { %p1156_p0 = pneg %p1155_p12  ;;  %p1162_p5 = por %p1161_p3, %p1160_p1 }
  0x3d   : > { %p1163_p6 = pnand %p1162_p5, %p1156_p0 }
  0x41   : > { %1002 = vmatmul.mubr.msk.bf16.vlgmr.msra.gmra.mxu0 %vm273_vm1, %v1103_v18  ;;  %1012 = vmatmul.mubr.msk.bf16.vlgmr.msra.gmra.mxu1 %vm273_vm1, %v1104_v19 }
  0x42   : > { %1005 = vmatprep.mubr.msk.bf16.mxu0 %vm273_vm1, %v1105_v20  ;;  %1015 = vmatprep.mubr.msk.bf16.mxu1 %vm273_vm1, %v1106_v21 }
  0x49   : > { %1006 = vmatmul.mubr.msk.bf16.gmra.mxu0 %vm273_vm1, %v1107_v22  ;;  %1016 = vmatmul.mubr.msk.bf16.gmra.mxu1 %vm273_vm1, %v1108_v23 }
  0xf1   : > { %v983_v24 = vpop.f32.mrf.mxu0  ;;  %v993_v25 = vpop.f32.mrf.mxu1 }
  0xf2   : > { %v438_v39 = vadd.f32 %v993_v25, %v983_v24 }
  0xf3   : > { %v324_v26 = vpop.f32.mrf.mxu0  ;;  %v429_v27 = vpop.f32.mrf.mxu1 }
  0xf4   : > { %v430_v42 = vadd.f32 %v429_v27, %v324_v26 }
  0xf5   : > { %v984_v28 = vpop.f32.mrf.mxu0  ;;  %v994_v29 = vpop.f32.mrf.mxu1 }
  0xf6   : > { %v441_v47 = vadd.f32 %v994_v29, %v984_v28 }
  0xf7   : > { %v327_v30 = vpop.f32.mrf.mxu0  ;;  %v432_v31 = vpop.f32.mrf.mxu1 }
  0xf8   : > { %v433_v52 = vadd.f32 %v432_v31, %v327_v30 }
  0xf9   : > { %v987_v32 = vpop.f32.mrf.mxu0  ;;  %v997_v33 = vpop.f32.mrf.mxu1 }
  0xfa   : > { %v454_v63 = vadd.f32 %v997_v33, %v987_v32 }
  0xfb   : > { %v340_v34 = vpop.f32.mrf.mxu0  ;;  %v445_v35 = vpop.f32.mrf.mxu1 }
  0xfc   : > { %v446_v6 = vadd.f32 %v445_v35, %v340_v34 }
  0xfd   : > { %v988_v36 = vpop.f32.mrf.mxu0  ;;  %v998_v37 = vpop.f32.mrf.mxu1 }
  0xfe   : > { %v457_v14 = vadd.f32 %v998_v37, %v988_v36 }
  0xff   : > { %v343_v38 = vpop.f32.mrf.mxu0  ;;  %v448_v40 = vpop.f32.mrf.mxu1 }
 0x100   : > { %v449_v23 = vadd.f32 %v448_v40, %v343_v38 }
 0x101   : > { %v1003_v41 = vpop.f32.mrf.mxu0  ;;  %v1013_v44 = vpop.f32.mrf.mxu1 }
 0x102   : > { %v570_v43 = vadd.f32 %v1003_v41, %v438_v39 }
 0x103   : > { %v537_v46 = vpop.f32.mrf.mxu0  ;;  %v653_v50 = vpop.f32.mrf.mxu1 }
 0x104   : > { %v686_v48 = vadd.f32 %v1013_v44, %v570_v43  ;;  %v568_v49 = vadd.f32 %v537_v46, %v430_v42 }
 0x105   : > { %v1004_v51 = vpop.f32.mrf.mxu0  ;;  %v1014_v56 = vpop.f32.mrf.mxu1 }
 0x106   : > { %v1413_v53 = vadd.f32 %v1410_v45, %v686_v48  ;;  %v684_v54 = vadd.f32 %v653_v50, %v568_v49  ;;  %v571_v55 = vadd.f32 %v1004_v51, %v441_v47 }
 0x107   : > { %v540_v57 = vpop.f32.mrf.mxu0  ;;  %v656_v62 = vpop.f32.mrf.mxu1 }
 0x108   : > { %v709_v58 = vmul.f32 %v1413_v53, %v1413_v53  ;;  %v1418_v59 = vadd.f32 %v1410_v45, %v684_v54  ;;  %v687_v60 = vadd.f32 %v1014_v56, %v571_v55  ;;  %v569_v61 = vadd.f32 %v540_v57, %v433_v52 }
 0x109   : > { %v1007_v0 = vpop.f32.mrf.mxu0  ;;  %v1017_v5 = vpop.f32.mrf.mxu1 }
 0x10a   : > { %v717_v1 = vmul.f32 %v709_v58, %v1413_v53  ;;  %v707_v2 = vmul.f32 %v1418_v59, %v1418_v59  ;;  %v1424_v3 = vadd.f32 %v1410_v45, %v687_v60  ;;  %v685_v4 = vadd.f32 %v656_v62, %v569_v61 }
 0x10b   : > { %v574_v7 = vadd.f32 %v1007_v0, %v454_v63  ;;  %v553_v8 = vpop.f32.mrf.mxu0  ;;  %v669_v13 = vpop.f32.mrf.mxu1 }
 0x10c   : > { %v725_v9 = vmul.f32 0.044715, %v717_v1  ;;  %v715_v10 = vmul.f32 %v707_v2, %v1418_v59  ;;  %v710_v11 = vmul.f32 %v1424_v3, %v1424_v3  ;;  %v1430_v12 = vadd.f32 %v1410_v45, %v685_v4 }
 0x10d   : > { %v690_v15 = vadd.f32 %v1017_v5, %v574_v7  ;;  %v572_v16 = vadd.f32 %v553_v8, %v446_v6  ;;  %v1008_v17 = vpop.f32.mrf.mxu0  ;;  %v1018_v22 = vpop.f32.mrf.mxu1 }
 0x10e   : > { %v733_v18 = vadd.f32 %v725_v9, %v1413_v53  ;;  %v723_v19 = vmul.f32 0.044715, %v715_v10  ;;  %v718_v20 = vmul.f32 %v710_v11, %v1424_v3  ;;  %v708_v21 = vmul.f32 %v1430_v12, %v1430_v12 }
 0x10f   : > { %v1437_v24 = vadd.f32 %v1410_v45, %v690_v15  ;;  %v688_v25 = vadd.f32 %v669_v13, %v572_v16  ;;  %v575_v26 = vadd.f32 %v1008_v17, %v457_v14  ;;  %v556_v27 = vpop.f32.mrf.mxu0  ;;  %v672_v39 = vpop.f32.mrf.mxu1 }
 0x110   : > { %v741_v28 = vmul.f32 0.7978846, %v733_v18  ;;  %v731_v29 = vadd.f32 %v723_v19, %v1418_v59  ;;  %v726_v30 = vmul.f32 0.044715, %v718_v20  ;;  %v716_v31 = vmul.f32 %v708_v21, %v1430_v12 }
 0x111   : > { %v713_v32 = vmul.f32 %v1437_v24, %v1437_v24  ;;  %v1444_v33 = vadd.f32 %v1410_v45, %v688_v25  ;;  %v691_v34 = vadd.f32 %v1018_v22, %v575_v26  ;;  %v573_v35 = vadd.f32 %v556_v27, %v449_v23 }
 0x112   : > { %1109 = vtanh.f32 %v741_v28  ;;  %v739_v36 = vmul.f32 0.7978846, %v731_v29  ;;  %v734_v37 = vadd.f32 %v726_v30, %v1424_v3  ;;  %v724_v38 = vmul.f32 0.044715, %v716_v31 }
 0x113   : > { %v721_v40 = vmul.f32 %v713_v32, %v1437_v24  ;;  %v711_v41 = vmul.f32 %v1444_v33, %v1444_v33  ;;  %v1451_v42 = vadd.f32 %v1410_v45, %v691_v34  ;;  %v689_v43 = vadd.f32 %v672_v39, %v573_v35 }
 0x114   : > { %1111 = vtanh.f32 %v739_v36  ;;  %v742_v44 = vmul.f32 0.7978846, %v734_v37  ;;  %v732_v46 = vadd.f32 %v724_v38, %v1430_v12 }
 0x115   : > { %v729_v47 = vmul.f32 0.044715, %v721_v40  ;;  %v719_v48 = vmul.f32 %v711_v41, %v1444_v33  ;;  %v714_v49 = vmul.f32 %v1451_v42, %v1451_v42  ;;  %v1458_v50 = vadd.f32 %v1410_v45, %v689_v43 }
 0x116   : > { %1113 = vtanh.f32 %v742_v44  ;;  %v740_v51 = vmul.f32 0.7978846, %v732_v46 }
 0x117   : > { %v737_v52 = vadd.f32 %v729_v47, %v1437_v24  ;;  %v727_v54 = vmul.f32 0.044715, %v719_v48  ;;  %v722_v55 = vmul.f32 %v714_v49, %v1451_v42  ;;  %v712_v56 = vmul.f32 %v1458_v50, %v1458_v50 }
 0x118   : > { %1115 = vtanh.f32 %v740_v51 }
 0x119   : > { %v745_v57 = vmul.f32 0.7978846, %v737_v52  ;;  %v735_v58 = vadd.f32 %v727_v54, %v1444_v33  ;;  %v730_v60 = vmul.f32 0.044715, %v722_v55  ;;  %v720_v61 = vmul.f32 %v712_v56, %v1458_v50 }
 0x11b   : > { %1117 = vtanh.f32 %v745_v57  ;;  %v743_v45 = vmul.f32 0.7978846, %v735_v58  ;;  %v738_v62 = vadd.f32 %v730_v60, %v1451_v42  ;;  %v728_v63 = vmul.f32 0.044715, %v720_v61 }
 0x11d   : > { %1119 = vtanh.f32 %v743_v45  ;;  %v746_v0 = vmul.f32 0.7978846, %v738_v62  ;;  %v736_v1 = vadd.f32 %v728_v63, %v1458_v50 }
 0x11f   : > { %v1110_v2 = vpop.eup %1109  ;;  %1121 = vtanh.f32 %v746_v0  ;;  %v744_v4 = vmul.f32 0.7978846, %v736_v1 }
 0x120   : > { %v757_v5 = vadd.f32 1.0, %v1110_v2 }
 0x121   : > { %v1112_v6 = vpop.eup %1111  ;;  %1123 = vtanh.f32 %v744_v4 }
 0x122   : > { %v765_v7 = vmul.f32 0.5, %v757_v5  ;;  %v755_v8 = vadd.f32 1.0, %v1112_v6 }
 0x123   : > { %v1114_v9 = vpop.eup %1113 }
 0x124   : > { %v773_v10 = vmul.f32 %v765_v7, %v1413_v53  ;;  %v763_v11 = vmul.f32 0.5, %v755_v8  ;;  %v758_v13 = vadd.f32 1.0, %v1114_v9 }
 0x125   : > { %v1116_v14 = vpop.eup %1115 }
 0x126   : > { %v781_v15 = vpack.c.bf16 %v773_v10, %v773_v10  ;;  %v771_v16 = vmul.f32 %v763_v11, %v1418_v59  ;;  %v766_v17 = vmul.f32 0.5, %v758_v13  ;;  %v756_v18 = vadd.f32 1.0, %v1116_v14 }
 0x128   : > { %v1118_v19 = vpop.eup %1117  ;;  %790 = vst.msk [vmem:[%s1471_s22 + $0x8] sm:$0xf] %vm787_vm2, %v781_v15  ;;  %v779_v20 = vpack.c.bf16 %v771_v16, %v771_v16  ;;  %v774_v53 = vmul.f32 %v766_v17, %v1424_v3  ;;  %v764_v21 = vmul.f32 0.5, %v756_v18 }
 0x129   : > { %v761_v22 = vadd.f32 1.0, %v1118_v19 }
 0x12a   : > { %v1120_v23 = vpop.eup %1119  ;;  %788 = vst.msk [vmem:[%s1471_s22] sm:$0xf] %vm787_vm2, %v779_v20  ;;  %v782_v59 = vpack.c.bf16 %v774_v53, %v774_v53  ;;  %v772_v25 = vmul.f32 %v764_v21, %v1430_v12 }
 0x12b   : > { %v769_v26 = vmul.f32 0.5, %v761_v22  ;;  %v759_v27 = vadd.f32 1.0, %v1120_v23 }
 0x12c   : > { %v1122_v28 = vpop.eup %1121  ;;  %791 = vst.msk [vmem:[%s1471_s22 + $0xc] sm:$0xf] %vm787_vm2, %v782_v59  ;;  %v780_v29 = vpack.c.bf16 %v772_v25, %v772_v25 }
 0x12d   : > { %v777_v3 = vmul.f32 %v769_v26, %v1437_v24  ;;  %v767_v30 = vmul.f32 0.5, %v759_v27  ;;  %v762_v31 = vadd.f32 1.0, %v1122_v28 }
 0x12e   : > { %v1124_v32 = vpop.eup %1123  ;;  %789 = vst.msk [vmem:[%s1471_s22 + $0x4] sm:$0xf] %vm787_vm2, %v780_v29 }
 0x12f   : > { %v785_v34 = vpack.c.bf16 %v777_v3, %v777_v3  ;;  %v775_v12 = vmul.f32 %v767_v30, %v1444_v33  ;;  %v770_v35 = vmul.f32 0.5, %v762_v31  ;;  %v760_v36 = vadd.f32 1.0, %v1124_v32 }
 0x131   : > { %794 = vst.msk [vmem:[%s1471_s22 + $0x18] sm:$0xf] %vm787_vm2, %v785_v34  ;;  %v783_v37 = vpack.c.bf16 %v775_v12, %v775_v12  ;;  %v778_v38 = vmul.f32 %v770_v35, %v1451_v42  ;;  %v768_v24 = vmul.f32 0.5, %v760_v36 }
 0x133   : > { %792 = vst.msk [vmem:[%s1471_s22 + $0x10] sm:$0xf] %vm787_vm2, %v783_v37  ;;  %v786_v39 = vpack.c.bf16 %v778_v38, %v778_v38  ;;  %v776_v40 = vmul.f32 %v768_v24, %v1458_v50 }
 0x135   : > { %795 = vst.msk [vmem:[%s1471_s22 + $0x1c] sm:$0xf] %vm787_vm2, %v786_v39  ;;  %v784_v33 = vpack.c.bf16 %v776_v40, %v776_v40 }
 0x137   : > { %793 = vst.msk [vmem:[%s1471_s22 + $0x14] sm:$0xf] %vm787_vm2, %v784_v33 }
 0x138   : > { %1166 = shalt.err (!%p1163_p6)
}
 0x139   : > { %s1167_s9 = scalar_lea.hbm %s1496_s5, 512  ;;  %s1171_s18 = scalar_lea.hbm %s1553_s3, 1024 }
 0x13a   : > { %p1168_p7 = scmp.ne.s32.totalorder %s1496_s5, %s1167_s9  ;;  %p1172_p13 = scmp.lt.s32.totalorder %s1496_s5, %s1553_s3 }
 0x13b   : > { %p1173_p2 = scmp.lt.s32.totalorder %s1171_s18, %s1167_s9 }
 0x13c   : > { %p1169_p10 = pnand %p1168_p7, %p1312_p9 }
 0x13d   : > { %p1174_p8 = por %p1173_p2, %p1172_p13 }
 0x13e   : > { %p1170_p4 = pneg %p1169_p10 }
 0x140   : > { %p1175_p12 = pnand %p1174_p8, %p1170_p4 }
 0x142   : > { %1178 = shalt.err (!%p1175_p12)
}
 0x143   : > { %s1239_s22 = smov 64   ;;  %s1240_s23 = smov 4  }
 0x144   : > { %1025 = dma.vmem_to_hbm [thread:$0]  (%p1312_p9), %s1498_s29, 512, %s1496_s5, %s797_s15, %s1239_s22, %s1239_s22, %s1240_s23  }
 0x145 PF: > { %s827_s30 = sand.u32 1, %s1213_s12   ;;  %p1559_p0 = scmp.ge.s32.totalorder %s1233_s17, 2 }
 0x146   : > { %s828_s4 = scalar_lea.sflag [#allocation4], %s827_s30 }
 0x147   : > { %p1032_p1 = pnand %p1559_p0, %p1319_p11 }
 0x149   : > { %p1033_p3 = pneg %p1032_p1 }
 0x14b   : > { %1208 = dma.done.wait (%p1033_p3), %s828_s4, 512  }
 0x14c   : > { %1210 = vsyncadd (%p1033_p3), %s828_s4, 4294966784  ;;  %s19_s17 = sadd.s32 1, %s1233_s17   ;;  %s1560_s12 = smov %s1217_s13 }
 0x14d   : > { %p16_p5 = scmp.ge.s32.totalorder %s19_s17, 4   ;;  %s1561_s13 = smov %s1221_s14 }
 0x14e   : > { %s1562_s14 = smov %s1317_s26  ;;  %s1563_s15 = smov %s1229_s16 }
 0x14f   : > { %s1564_s16 = smov %s1566_s20  ;;  %18 = sbr.rel (!%p16_p5) target bundleno = 6 (0x6), region = 80 }
 0x154   :  { %833 = vsyncpa [#allocation3], 1 }
 0x155   :  { %835 = vsyncpa [#allocation3 + $0x1], 1 }
 0x156   :  { %836 = vsyncpa [#allocation4], 1 }
 0x157   :  { %838 = vsyncpa [#allocation4 + $0x1], 1 }

</bundles_post_ra>
